<compile_context>
chip_gen: v6e
topology: v6e:2x2x1
jax: 0.10.0
libtpu: 0.0.40
codegen_flags: <defaults>
</compile_context>

<pallas_src>
import math
from functools import partial

import jax
import jax.numpy as jnp
from jax.experimental import pallas as pl
from jax.experimental.pallas import tpu as pltpu


_ROWS_PER_CHUNK_MAX = 8192            # 8192 rows * 128 lanes * 4 B = 4 MiB / chunk
_VMEM_LIMIT_BYTES = 48 * 1024 * 1024  # double-buffered inputs + f32 temporaries


def _round_up(x, m):
    return -(-x // m) * m


def _cdiv(a, b):
    return -(-a // b)


def _make_l1_sums_kernel(rows, acc_sub, core_stride, chunks_total, m_rows, overlap):
    """Kernel over grid (n_cores, chunks_per_core).

    a_ref, b_ref : (rows, 128) lane-dense embedding rows (f32 or bf16)
    w_ref        : (p_tok, rows) per-token |weights| (f32), lane-dense along rows
    src_ref      : (acc_sub, 128) resident per-core accumulator, sum |a-b|
    wgt_ref      : (p_tok, 128)  resident per-core accumulator, W @ |a-b|
    """
    need_row_mask = chunks_total * rows != m_rows

    def accumulate(a_ref, b_ref, w_ref, src_ref, wgt_ref):
        a = a_ref[...]
        b = b_ref[...]
        if a.dtype != jnp.float32:
            a = a.astype(jnp.float32)
            b = b.astype(jnp.float32)
        d = jnp.abs(a - b)                                  # (rows, 128), VPU only

        if need_row_mask:
            # Zero out rows past the end of the (unpadded) embedding; the
            # trailing portion of the last chunk's DMA buffer is unspecified.
            gchunk = pl.program_id(0) * core_stride + pl.program_id(1)
            row_ids = jax.lax.broadcasted_iota(jnp.int32, (rows, 128), 0)
            d = jnp.where(row_ids + gchunk * rows < m_rows, d, 0.0)

        # Unweighted sum: wide accumulator -> 8 independent add chains.
        src_ref[...] += jnp.sum(d.reshape(rows // acc_sub, acc_sub, 128), axis=0)
        # Weighted sum: one skinny MXU matmul per chunk (MXU is otherwise idle).
        wgt_ref[...] += jnp.dot(w_ref[...], d, preferred_element_type=jnp.float32)

    def kernel(a_ref, b_ref, w_ref, src_ref, wgt_ref):
        c = pl.program_id(1)

        @pl.when(c == 0)
        def _():
            src_ref[...] = jnp.zeros_like(src_ref)
            wgt_ref[...] = jnp.zeros_like(wgt_ref)

        if overlap:
            # When the chunk count is odd, core 1's first chunk duplicates
            # core 0's last chunk (kept in bounds on purpose) -> skip it.
            dup = jnp.logical_and(pl.program_id(0) == 1, c == 0)

            @pl.when(jnp.logical_not(dup))
            def _():
                accumulate(a_ref, b_ref, w_ref, src_ref, wgt_ref)
        else:
            accumulate(a_ref, b_ref, w_ref, src_ref, wgt_ref)

    return kernel


@partial(jax.jit, static_argnames=("rows_override",))
def _block_l1_means(img, ev, w, rows_override=None):
    """Returns (mean |img-ev|, mean |img*w - ev*w|) for one loss block."""
    shape = img.shape
    d_feat = int(shape[-1])
    total_elems = math.prod(shape)
    n_tok = total_elems // d_feat

    lane_ok = (total_elems % 128 == 0 and
               (128 % d_feat == 0 or d_feat % 128 == 0))
    if not lane_ok:
        # TODO(synk): pad awkward feature dims into the lane-dense layout;
        # plain XLA fallback for such shapes.
        a = img.astype(jnp.float32)
        b = ev.astype(jnp.float32)
        wf = w.astype(jnp.float32)
        return (jnp.mean(jnp.abs(a - b)),
                jnp.mean(jnp.abs(a * wf - b * wf)))

    m_rows = total_elems // 128
    d_lanes = min(d_feat, 128)
    p_tok = 128 // d_lanes

    # ---- chunk sizing (rows per grid step) ----
    if rows_override is not None:
        rows = _round_up(int(rows_override), 32)
    else:
        n_chunks_goal = _cdiv(m_rows, _ROWS_PER_CHUNK_MAX)
        if n_chunks_goal <= 1:
            rows = _round_up(m_rows, 32)
        else:
            rows = min(_ROWS_PER_CHUNK_MAX,
                       _round_up(_cdiv(m_rows, n_chunks_goal), 512))
    chunks_total = _cdiv(m_rows, rows)
    if chunks_total > 1 and rows % 128 != 0:
        rows = _round_up(rows, 128)       # weight-block lane constraint
        chunks_total = _cdiv(m_rows, rows)
    acc_sub = 64 if rows % 64 == 0 else 8

    # ---- split chunks across (up to) two TensorCores, keeping all block
    #      indices strictly in bounds (core 1 starts at chunks_total - cpc). ----
    n_cores = 2 if chunks_total >= 2 else 1
    cpc = _cdiv(chunks_total, n_cores)
    core_stride = (chunks_total - cpc) if n_cores == 2 else 0
    overlap = n_cores * cpc - chunks_total          # 0 or 1 duplicated chunk

    # Free, lane-dense views of the embeddings (no HBM copy).
    a2 = img.reshape(m_rows, 128)
    b2 = ev.reshape(m_rows, 128)

    # Per-token |weights| laid out lane-dense along the row axis (tiny array).
    wf = jnp.abs(w.reshape(n_tok).astype(jnp.float32))
    if d_feat <= 128:
        w_rows = wf.reshape(m_rows, p_tok).T                 # (p_tok, m_rows)
    else:
        w_rows = jnp.repeat(wf, d_feat // 128).reshape(1, m_rows)
    w_cols = chunks_total * rows
    if w_cols != m_rows:
        w_rows = jnp.pad(w_rows, ((0, 0), (0, w_cols - m_rows)))

    kernel = _make_l1_sums_kernel(rows, acc_sub, core_stride, chunks_total,
                                  m_rows, overlap)

    src_acc, wgt_acc = pl.pallas_call(
        kernel,
        out_shape=(jax.ShapeDtypeStruct((n_cores, acc_sub, 128), jnp.float32),
                   jax.ShapeDtypeStruct((n_cores, p_tok, 128), jnp.float32)),
        grid_spec=pltpu.PrefetchScalarGridSpec(
            num_scalar_prefetch=0,
            grid=(n_cores, cpc),
            in_specs=[
                pl.BlockSpec((rows, 128),
                             lambda core, c: (core * core_stride + c, 0)),
                pl.BlockSpec((rows, 128),
                             lambda core, c: (core * core_stride + c, 0)),
                pl.BlockSpec((p_tok, rows),
                             lambda core, c: (0, core * core_stride + c)),
            ],
            out_specs=[
                pl.BlockSpec((None, acc_sub, 128), lambda core, c: (core, 0, 0)),
                pl.BlockSpec((None, p_tok, 128), lambda core, c: (core, 0, 0)),
            ],
        ),
        compiler_params=pltpu.CompilerParams(
            dimension_semantics=("parallel", "arbitrary"),
            vmem_limit_bytes=_VMEM_LIMIT_BYTES,
        ),
    )(a2, b2, w_rows)

    numel = jnp.float32(total_elems)
    src_mean = jnp.sum(src_acc) / numel

    # wgt_acc[core, p, l] = sum_r |w|[token(r, p)] * |a-b|[r, l]; only lanes of
    # token slot p belong to the weighted loss -> mask and reduce.
    lane_slot = jnp.arange(128) // d_lanes
    slot_mask = (lane_slot[None, :] ==
                 jnp.arange(p_tok)[:, None]).astype(jnp.float32)   # (p_tok, 128)
    wgt_mean = jnp.sum(wgt_acc * slot_mask[None, :, :]) / numel
    return src_mean, wgt_mean


class TotalLoss:
    """JAX/Pallas port of the PyTorch TotalLoss module (forward pass)."""

    def __init__(self, block_feature_indexes, block_loss_weight,
                 rows_per_chunk=None):
        self.block_feature_indexes = list(block_feature_indexes)
        self.block_loss_weight = [float(x) for x in block_loss_weight]
        self.rows_per_chunk = rows_per_chunk    # tuning / testing knob

    def __call__(self, image_embeddings_dict, evimg_embeddings_dict,
                 token_weights_dict):
        n = len(token_weights_dict)
        total = jnp.float32(0.0)
        src_list, wgt_list = [], []
        for i in range(n):
            key = "block_{}".format(self.block_feature_indexes[i])
            src, wgt = _block_l1_means(
                image_embeddings_dict[key],
                evimg_embeddings_dict[key],
                token_weights_dict[key],
                rows_override=self.rows_per_chunk)
            src_list.append(src)
            wgt_list.append(wgt)
            total = total + jnp.float32(self.block_loss_weight[i]) * wgt
        return total, src_list, wgt_list


def _reference(image_d, evimg_d, token_w_d, block_idx, block_w):
    """Pure-JAX reference mirroring the PyTorch module exactly."""
    total = jnp.float32(0.0)
    src_list, blk_list = [], []
    for i in range(len(token_w_d)):
        key = "block_{}".format(block_idx[i])
        a = image_d[key].astype(jnp.float32)
        b = evimg_d[key].astype(jnp.float32)
        w = token_w_d[key].astype(jnp.float32)
        src = jnp.mean(jnp.abs(a - b))
        blk = jnp.mean(jnp.abs(a * w - b * w))
        total = total + block_w[i] * blk
        src_list.append(src)
        blk_list.append(blk)
    return total, src_list, blk_list


if __name__ == "__main__":
    key = jax.random.PRNGKey(0)
    block_ids = [1, 3]
    block_ws = [0.5, 1.5]

    def make_inputs(key, B, N, D, dtype=jnp.float32):
        img_d, ev_d, w_d = {}, {}, {}
        for bi in block_ids:
            key, k1, k2, k3 = jax.random.split(key, 4)
            name = "block_{}".format(bi)
            img_d[name] = jax.random.normal(k1, (B, N, D), jnp.float32).astype(dtype)
            ev_d[name] = jax.random.normal(k2, (B, N, D), jnp.float32).astype(dtype)
            w_d[name] = jax.nn.softmax(
                jax.random.normal(k3, (B, N, 1), jnp.float32), axis=1)
        return key, img_d, ev_d, w_d

    def check(cfg, img_d, ev_d, w_d, rows_per_chunk=None):
        loss_fn = TotalLoss(block_ids, block_ws, rows_per_chunk=rows_per_chunk)
        total, src_list, wgt_list = loss_fn(img_d, ev_d, w_d)
        jax.block_until_ready(total)
        ref_total, ref_src, ref_wgt = _reference(img_d, ev_d, w_d,
                                                 block_ids, block_ws)
        # Source losses use an exact-f32 VPU accumulation path (tight tol).
        for x, y in zip(src_list, ref_src):
            assert bool(jnp.allclose(x, y, rtol=1e-4, atol=1e-6)), cfg
        # Weighted losses go through the f32(-emulated) MXU matmul plus the
        # |a*w - b*w| -> |a-b|*|w| reassociation.
        for x, y in zip(wgt_list, ref_wgt):
            assert bool(jnp.allclose(x, y, rtol=5e-3, atol=1e-7)), cfg
        assert bool(jnp.allclose(total, ref_total, rtol=5e-3, atol=1e-7)), cfg

    # cfg1: small transformer blocks, D=32 (4 tokens per 128-lane row),
    # single chunk per block.
    key, img_d, ev_d, w_d = make_inputs(key, B=2, N=256, D=32)
    check("cfg1", img_d, ev_d, w_d)

    # cfg2: feature dim >= 128 path (D=256), single small chunk.
    key, img_d2, ev_d2, w_d2 = make_inputs(key, B=2, N=8, D=256)
    check("cfg2", img_d2, ev_d2, w_d2)

    # cfg3: multi-chunk + dual-core split + ragged trailing chunk
    # (m_rows=750, rows=128 -> 6 chunks, last has 110 valid rows).
    key, img_d3, ev_d3, w_d3 = make_inputs(key, B=3, N=1000, D=32)
    check("cfg3", img_d3, ev_d3, w_d3, rows_per_chunk=128)

    # cfg4: odd chunk count (5) -> core overlap chunk skipped via pl.when.
    key, img_d4, ev_d4, w_d4 = make_inputs(key, B=2, N=320, D=128)
    check("cfg4", img_d4, ev_d4, w_d4, rows_per_chunk=128)

    # cfg5: bf16 embeddings (cast inside the kernel).
    img_d5 = {k: v.astype(jnp.bfloat16) for k, v in img_d.items()}
    ev_d5 = {k: v.astype(jnp.bfloat16) for k, v in ev_d.items()}
    check("cfg5", img_d5, ev_d5, w_d)

    print("KERNEL_OK")
</pallas_src>

<mosaic_0001>
module attributes {stable_mosaic.version = 11 : i64} {
  func.func @kernel(%arg0: i32, %arg1: i32, %arg2: memref<128x128xf32, #tpu.memory_space<vmem>>, %arg3: memref<128x128xf32, #tpu.memory_space<vmem>>, %arg4: memref<4x128xf32, #tpu.memory_space<vmem>>, %arg5: memref<1x64x128xf32, #tpu.memory_space<vmem>>, %arg6: memref<1x4x128xf32, #tpu.memory_space<vmem>>) attributes {dimension_semantics = [#tpu.dimension_semantics<parallel>, #tpu.dimension_semantics<arbitrary>], iteration_bounds = array<i64: 1, 1>, scalar_prefetch = 0 : i64, scratch_operands = 0 : i64, tpu.core_type = #tpu.core_type<tc>, window_params = [{transform_indices = @transform_0, window_bounds = array<i64: 128, 128>}, {transform_indices = @transform_1, window_bounds = array<i64: 128, 128>}, {transform_indices = @transform_2, window_bounds = array<i64: 4, 128>}, {transform_indices = @transform_3, window_bounds = array<i64: 1, 64, 128>}, {transform_indices = @transform_4, window_bounds = array<i64: 1, 4, 128>}]} {
    %c0_i32 = arith.constant 0 : i32
    %0 = arith.cmpi eq, %arg1, %c0_i32 : i32
    %1 = arith.extui %0 : i1 to i32
    %c0_i32_0 = arith.constant 0 : i32
    %2 = arith.cmpi ne, %1, %c0_i32_0 : i32
    scf.if %2 {
      %cst_19 = arith.constant 0.000000e+00 : f32
      %23 = vector.broadcast %cst_19 : f32 to vector<64x128xf32>
      %c0_20 = arith.constant 0 : index
      %c0_21 = arith.constant 0 : index
      %c0_22 = arith.constant 0 : index
      %24 = vector.load %arg5[%c0_20, %c0_21, %c0_22] : memref<1x64x128xf32, #tpu.memory_space<vmem>>, vector<1x64x128xf32>
      %25 = vector.shape_cast %24 : vector<1x64x128xf32> to vector<64x128xf32>
      %26 = vector.shape_cast %23 : vector<64x128xf32> to vector<1x64x128xf32>
      tpu.vector_store %arg5[%c0_20, %c0_21, %c0_22], %26 {strides = array<i32>} : memref<1x64x128xf32, #tpu.memory_space<vmem>>, vector<1x64x128xf32>,
      %cst_23 = arith.constant 0.000000e+00 : f32
      %27 = vector.broadcast %cst_23 : f32 to vector<4x128xf32>
      %c0_24 = arith.constant 0 : index
      %c0_25 = arith.constant 0 : index
      %c0_26 = arith.constant 0 : index
      %28 = vector.load %arg6[%c0_24, %c0_25, %c0_26] : memref<1x4x128xf32, #tpu.memory_space<vmem>>, vector<1x4x128xf32>
      %29 = vector.shape_cast %28 : vector<1x4x128xf32> to vector<4x128xf32>
      %30 = vector.shape_cast %27 : vector<4x128xf32> to vector<1x4x128xf32>
      tpu.vector_store %arg6[%c0_24, %c0_25, %c0_26], %30 {strides = array<i32>} : memref<1x4x128xf32, #tpu.memory_space<vmem>>, vector<1x4x128xf32>,
    } else {
    }
    %c0 = arith.constant 0 : index
    %c0_1 = arith.constant 0 : index
    %3 = vector.load %arg2[%c0, %c0_1] : memref<128x128xf32, #tpu.memory_space<vmem>>, vector<128x128xf32>
    %c0_2 = arith.constant 0 : index
    %c0_3 = arith.constant 0 : index
    %4 = vector.load %arg3[%c0_2, %c0_3] : memref<128x128xf32, #tpu.memory_space<vmem>>, vector<128x128xf32>
    %5 = arith.subf %3, %4 : vector<128x128xf32>
    %6 = math.absf %5 : vector<128x128xf32>
    %c0_4 = arith.constant 0 : index
    %c0_5 = arith.constant 0 : index
    %c0_6 = arith.constant 0 : index
    %7 = vector.load %arg5[%c0_4, %c0_5, %c0_6] : memref<1x64x128xf32, #tpu.memory_space<vmem>>, vector<1x64x128xf32>
    %8 = vector.shape_cast %7 : vector<1x64x128xf32> to vector<64x128xf32>
    %9 = vector.shape_cast %6 : vector<128x128xf32> to vector<2x64x128xf32>
    %cst = arith.constant dense<0.000000e+00> : vector<64x128xf32>
    %10 = vector.multi_reduction <add>, %9, %cst [0] : vector<2x64x128xf32> to vector<64x128xf32>
    %11 = arith.addf %8, %10 : vector<64x128xf32>
    %c0_7 = arith.constant 0 : index
    %c0_8 = arith.constant 0 : index
    %c0_9 = arith.constant 0 : index
    %12 = vector.load %arg5[%c0_7, %c0_8, %c0_9] : memref<1x64x128xf32, #tpu.memory_space<vmem>>, vector<1x64x128xf32>
    %13 = vector.shape_cast %12 : vector<1x64x128xf32> to vector<64x128xf32>
    %14 = vector.shape_cast %11 : vector<64x128xf32> to vector<1x64x128xf32>
    tpu.vector_store %arg5[%c0_7, %c0_8, %c0_9], %14 {strides = array<i32>} : memref<1x64x128xf32, #tpu.memory_space<vmem>>, vector<1x64x128xf32>,
    %c0_10 = arith.constant 0 : index
    %c0_11 = arith.constant 0 : index
    %c0_12 = arith.constant 0 : index
    %15 = vector.load %arg6[%c0_10, %c0_11, %c0_12] : memref<1x4x128xf32, #tpu.memory_space<vmem>>, vector<1x4x128xf32>
    %16 = vector.shape_cast %15 : vector<1x4x128xf32> to vector<4x128xf32>
    %c0_13 = arith.constant 0 : index
    %c0_14 = arith.constant 0 : index
    %17 = vector.load %arg4[%c0_13, %c0_14] : memref<4x128xf32, #tpu.memory_space<vmem>>, vector<4x128xf32>
    %cst_15 = arith.constant dense<0.000000e+00> : vector<4x128xf32>
    %18 = tpu.matmul %17, %6, %cst_15 {dimension_numbers = #tpu.dot_dimension_numbers<[1], [0], [0], [1], [0, 0, 1, 1], [], []>} : vector<4x128xf32>, vector<128x128xf32>, vector<4x128xf32> -> vector<4x128xf32>
    %19 = arith.addf %16, %18 : vector<4x128xf32>
    %c0_16 = arith.constant 0 : index
    %c0_17 = arith.constant 0 : index
    %c0_18 = arith.constant 0 : index
    %20 = vector.load %arg6[%c0_16, %c0_17, %c0_18] : memref<1x4x128xf32, #tpu.memory_space<vmem>>, vector<1x4x128xf32>
    %21 = vector.shape_cast %20 : vector<1x4x128xf32> to vector<4x128xf32>
    %22 = vector.shape_cast %19 : vector<4x128xf32> to vector<1x4x128xf32>
    tpu.vector_store %arg6[%c0_16, %c0_17, %c0_18], %22 {strides = array<i32>} : memref<1x4x128xf32, #tpu.memory_space<vmem>>, vector<1x4x128xf32>,
    return
  }
  func.func @transform_0(%arg0: i32, %arg1: i32) -> (i32, i32) {
    %c0_i32 = arith.constant 0 : i32
    %0 = arith.muli %arg0, %c0_i32 : i32
    %1 = arith.addi %0, %arg1 : i32
    %c0_i32_0 = arith.constant 0 : i32
    %c0_i32_1 = arith.constant 0 : i32
    return %1, %c0_i32_0 : i32, i32
  }
  func.func @transform_1(%arg0: i32, %arg1: i32) -> (i32, i32) {
    %c0_i32 = arith.constant 0 : i32
    %0 = arith.muli %arg0, %c0_i32 : i32
    %1 = arith.addi %0, %arg1 : i32
    %c0_i32_0 = arith.constant 0 : i32
    %c0_i32_1 = arith.constant 0 : i32
    return %1, %c0_i32_0 : i32, i32
  }
  func.func @transform_2(%arg0: i32, %arg1: i32) -> (i32, i32) {
    %c0_i32 = arith.constant 0 : i32
    %0 = arith.muli %arg0, %c0_i32 : i32
    %1 = arith.addi %0, %arg1 : i32
    %c0_i32_0 = arith.constant 0 : i32
    %c0_i32_1 = arith.constant 0 : i32
    return %c0_i32_0, %1 : i32, i32
  }
  func.func @transform_3(%arg0: i32, %arg1: i32) -> (i32, i32, i32) {
    %c0_i32 = arith.constant 0 : i32
    %c0_i32_0 = arith.constant 0 : i32
    %c0_i32_1 = arith.constant 0 : i32
    return %arg0, %c0_i32, %c0_i32_0 : i32, i32, i32
  }
  func.func @transform_4(%arg0: i32, %arg1: i32) -> (i32, i32, i32) {
    %c0_i32 = arith.constant 0 : i32
    %c0_i32_0 = arith.constant 0 : i32
    %c0_i32_1 = arith.constant 0 : i32
    return %arg0, %c0_i32, %c0_i32_0 : i32, i32, i32
  }
}

</mosaic_0001>

<bundles_post_ra>
// kernel: _block_l1_means.1
= control target key start
LH: loop header
LB: loop body
LE: loop exit
PB: predicated region body
PF: predicated region fallthrough
CT: control target
= control target key end

     0   :  { %v261_v0 = vmov 0.0   ;;  %vm262_vm0 = vmmov 0   ;;  %s442_s0 = inlined_call_operand.vmem [shape: f32[128,128], index: 0, kind: input, shape index: {}]   ;;  %s443_s1 = inlined_call_operand.vmem [shape: f32[128,128], index: 1, kind: input, shape index: {}]   ;;  %s444_s4 = inlined_call_operand.vmem [shape: f32[1,4,128], index: 4, kind: output, shape index: {1}]   ;;  %s445_s3 = inlined_call_operand.vmem [shape: f32[1,64,128], index: 3, kind: output, shape index: {0}]   ;;  %s446_s2 = inlined_call_operand.vmem [shape: f32[4,128], index: 2, kind: input, shape index: {}]  }
   0x1   :  { %224 = vmatprep.subr.mxu0 %v261_v0  ;;  %v36_v1 = vld [vmem:[%s442_s0 + $0x38] sm:$0xff]  ;;  %256 = vmatprep.mubr.msk.f32.mxu0 %vm262_vm0, %v261_v0  ;;  %28 = vst [vmem:[%s444_s4] sm:$0xf] %v261_v0  ;;  %v43_v6 = vld [vmem:[%s442_s0 + $0x70] sm:$0xff]  ;;  %v42_v10 = vld [vmem:[%s442_s0 + $0x68] sm:$0xff] }
   0x2   :  { %v44_v2 = vld [vmem:[%s442_s0 + $0x78] sm:$0xff]  ;;  %v59_v7 = vld [vmem:[%s443_s1 + $0x70] sm:$0xff]  ;;  %v58_v11 = vld [vmem:[%s443_s1 + $0x68] sm:$0xff] }
   0x3   :  { %v52_v3 = vld [vmem:[%s443_s1 + $0x38] sm:$0xff]  ;;  %v75_v9 = vsub.f32 %v43_v6, %v59_v7  ;;  %v41_v12 = vld [vmem:[%s442_s0 + $0x60] sm:$0xff]  ;;  %v74_v14 = vsub.f32 %v42_v10, %v58_v11  ;;  %v39_v21 = vld [vmem:[%s442_s0 + $0x50] sm:$0xff] }
   0x4   :  { %v60_v4 = vld [vmem:[%s443_s1 + $0x78] sm:$0xff]  ;;  %v68_v5 = vsub.f32 %v36_v1, %v52_v3  ;;  %v57_v15 = vld [vmem:[%s443_s1 + $0x60] sm:$0xff]  ;;  %v55_v22 = vld [vmem:[%s443_s1 + $0x50] sm:$0xff] }
   0x5   :  { %v76_v8 = vsub.f32 %v44_v2, %v60_v4  ;;  %v40_v16 = vld [vmem:[%s442_s0 + $0x58] sm:$0xff]  ;;  %v91_v19 = vand.u32 2147483647, %v75_v9  ;;  %v73_v20 = vsub.f32 %v41_v12, %v57_v15  ;;  %v38_v24 = vld [vmem:[%s442_s0 + $0x48] sm:$0xff]  ;;  %v90_v27 = vand.u32 2147483647, %v74_v14 }
   0x6   :  { %v321_v13 = vand.u32 2147483647, %v68_v5  ;;  %v56_v17 = vld [vmem:[%s443_s1 + $0x58] sm:$0xff]  ;;  %v54_v25 = vld [vmem:[%s443_s1 + $0x48] sm:$0xff]  ;;  %v37_v28 = vld [vmem:[%s442_s0 + $0x40] sm:$0xff]  ;;  %v71_v31 = vsub.f32 %v39_v21, %v55_v22 }
   0x7   :  { %v92_v18 = vand.u32 2147483647, %v76_v8  ;;  %v72_v23 = vsub.f32 %v40_v16, %v56_v17  ;;  %v53_v29 = vld [vmem:[%s443_s1 + $0x40] sm:$0xff]  ;;  %v35_v30 = vld [vmem:[%s442_s0 + $0x30] sm:$0xff]  ;;  %v34_v33 = vld [vmem:[%s442_s0 + $0x28] sm:$0xff]  ;;  %v70_v42 = vsub.f32 %v38_v24, %v54_v25 }
   0x8   :  { %v51_v32 = vld [vmem:[%s443_s1 + $0x30] sm:$0xff]  ;;  %v50_v34 = vld [vmem:[%s443_s1 + $0x28] sm:$0xff]  ;;  %v89_v35 = vand.u32 2147483647, %v73_v20  ;;  %v33_v38 = vld [vmem:[%s442_s0 + $0x20] sm:$0xff]  ;;  %v69_v54 = vsub.f32 %v37_v28, %v53_v29 }
   0x9   :  { %v108_v26 = vadd.f32 %v92_v18, %v321_v13  ;;  %225 = vmatpush3.msra.mxu0 %v92_v18  ;;  %v67_v36 = vsub.f32 %v35_v30, %v51_v32  ;;  %v66_v37 = vsub.f32 %v34_v33, %v50_v34  ;;  %v49_v39 = vld [vmem:[%s443_s1 + $0x20] sm:$0xff]  ;;  %v32_v40 = vld [vmem:[%s442_s0 + $0x18] sm:$0xff]  ;;  %v88_v41 = vand.u32 2147483647, %v72_v23  ;;  %v31_v45 = vld [vmem:[%s442_s0 + $0x10] sm:$0xff] }
   0xa   :  { %226 = vmatprep.subr.mxu0 %v261_v0  ;;  %v65_v43 = vsub.f32 %v33_v38, %v49_v39  ;;  %v48_v44 = vld [vmem:[%s443_s1 + $0x18] sm:$0xff]  ;;  %v47_v46 = vld [vmem:[%s443_s1 + $0x10] sm:$0xff]  ;;  %v30_v51 = vld [vmem:[%s442_s0 + $0x8] sm:$0xff]  ;;  %v87_v53 = vand.u32 2147483647, %v71_v31 }
   0xb   :  { %227 = vmatpush3.msra.mxu0 %v91_v19  ;;  %124 = vst [vmem:[%s445_s3 + $0x38] sm:$0xff] %v108_v26  ;;  %v83_v47 = vand.u32 2147483647, %v67_v36  ;;  %v82_v48 = vand.u32 2147483647, %v66_v37  ;;  %v64_v49 = vsub.f32 %v32_v40, %v48_v44  ;;  %v63_v50 = vsub.f32 %v31_v45, %v47_v46  ;;  %v46_v52 = vld [vmem:[%s443_s1 + $0x8] sm:$0xff] }
   0xc   :  { %228 = vmatprep.subr.mxu0 %v261_v0  ;;  %v81_v55 = vand.u32 2147483647, %v65_v43  ;;  %v62_v56 = vsub.f32 %v30_v51, %v46_v52  ;;  %v29_v57 = vld [vmem:[%s442_s0] sm:$0xff]  ;;  %v86_v63 = vand.u32 2147483647, %v70_v42 }
   0xd   :  { %229 = vmatpush3.msra.mxu0 %v90_v27  ;;  %v45_v58 = vld [vmem:[%s443_s1] sm:$0xff]  ;;  %v107_v59 = vadd.f32 %v91_v19, %v83_v47  ;;  %v106_v60 = vadd.f32 %v90_v27, %v82_v48  ;;  %v80_v61 = vand.u32 2147483647, %v64_v49  ;;  %v79_v62 = vand.u32 2147483647, %v63_v50 }
   0xe   :  { %230 = vmatprep.subr.mxu0 %v261_v0  ;;  %v105_v1 = vadd.f32 %v89_v35, %v81_v55  ;;  %v78_v2 = vand.u32 2147483647, %v62_v56  ;;  %v61_v3 = vsub.f32 %v29_v57, %v45_v58  ;;  %v85_v6 = vand.u32 2147483647, %v69_v54  ;;  %v126_v10 = vld [vmem:[%s446_s2] sm:$0xf] }
   0xf   :  { %231 = vmatpush3.msra.mxu0 %v89_v35  ;;  %v104_v4 = vadd.f32 %v88_v41, %v80_v61  ;;  %v103_v5 = vadd.f32 %v87_v53, %v79_v62  ;;  %123 = vst [vmem:[%s445_s3 + $0x30] sm:$0xff] %v107_v59  ;;  %122 = vst [vmem:[%s445_s3 + $0x28] sm:$0xff] %v106_v60  ;;  %v125_v11 = vld [vmem:[%s444_s4] sm:$0xf] }
  0x10   :  { %232 = vmatprep.subr.mxu0 %v261_v0  ;;  %v102_v7 = vadd.f32 %v86_v63, %v78_v2  ;;  %v77_v8 = vand.u32 2147483647, %v61_v3  ;;  %121 = vst [vmem:[%s445_s3 + $0x20] sm:$0xff] %v105_v1 }
  0x11   :  { %233 = vmatpush3.msra.mxu0 %v88_v41  ;;  %120 = vst [vmem:[%s445_s3 + $0x18] sm:$0xff] %v104_v4  ;;  %119 = vst [vmem:[%s445_s3 + $0x10] sm:$0xff] %v103_v5 }
  0x12   :  { %234 = vmatprep.subr.mxu0 %v261_v0  ;;  %v101_v9 = vadd.f32 %v85_v6, %v77_v8  ;;  %118 = vst [vmem:[%s445_s3 + $0x8] sm:$0xff] %v102_v7 }
  0x13   :  { %235 = vmatpush3.msra.mxu0 %v87_v53 }
  0x14   :  { %236 = vmatprep.subr.mxu0 %v261_v0  ;;  %117 = vst [vmem:[%s445_s3] sm:$0xff] %v101_v9 }
  0x15   :  { %237 = vmatpush3.msra.mxu0 %v86_v63 }
  0x16   :  { %238 = vmatprep.subr.mxu0 %v261_v0 }
  0x17   :  { %239 = vmatpush3.msra.mxu0 %v85_v6 }
  0x18   :  { %240 = vmatprep.subr.mxu0 %v261_v0 }
  0x19   :  { %241 = vmatpush3.msra.mxu0 %v321_v13 }
  0x1a   :  { %242 = vmatprep.subr.mxu0 %v261_v0 }
  0x1b   :  { %243 = vmatpush3.msra.mxu0 %v83_v47 }
  0x1c   :  { %244 = vmatprep.subr.mxu0 %v261_v0 }
  0x1d   :  { %245 = vmatpush3.msra.mxu0 %v82_v48 }
  0x1e   :  { %246 = vmatprep.subr.mxu0 %v261_v0 }
  0x1f   :  { %247 = vmatpush3.msra.mxu0 %v81_v55 }
  0x20   :  { %248 = vmatprep.subr.mxu0 %v261_v0 }
  0x21   :  { %249 = vmatpush3.msra.mxu0 %v80_v61 }
  0x22   :  { %250 = vmatprep.subr.mxu0 %v261_v0 }
  0x23   :  { %251 = vmatpush3.msra.mxu0 %v79_v62 }
  0x24   :  { %252 = vmatprep.subr.mxu0 %v261_v0 }
  0x25   :  { %253 = vmatpush3.msra.mxu0 %v78_v2 }
  0x26   :  { %254 = vmatprep.subr.mxu0 %v261_v0 }
  0x27   :  { %255 = vmatpush3.msra.mxu0 %v77_v8 }
  0x28   :  { %257 = vmatmul.mubr.f32.vlgmr.msra.gmra.mxu0 %v126_v10 }
  0xe8   :  { %v193_v12 = vpop.f32.mrf.mxu0 }
  0xe9   :  { %v197_v13 = vadd.f32 %v193_v12, %v125_v11 }
  0xea   :  { %v258_v14 = vpop.f32.mrf.mxu0 }
  0xeb   :  { %198 = vst [vmem:[%s444_s4] sm:$0xf] %v197_v13 }

</bundles_post_ra>
